<compile_context>
chip_gen: v7x
topology: tpu7x:2x2x1
jax: 0.10.0
libtpu: 0.0.40
codegen_flags: <defaults>
</compile_context>

<pallas_src>
import functools

import jax
import jax.numpy as jnp
from jax.experimental import pallas as pl
from jax.experimental.pallas import tpu as pltpu

_SUB = 8                        # f32 sublanes per vreg tile
_LANE = 128                     # lanes per vreg tile
_ALIGN = _SUB * _LANE           # 1024: flat stream padded (only if needed) to this
_MAX_BLOCK_ROWS = 8192          # (8192, 128) f32 = 4 MiB per input per pipeline buffer
_CHUNK_ROWS = 256               # in-kernel sub-chunk: keeps elementwise temps small
_VMEM_LIMIT_BYTES = 40 * 1024 * 1024   # 16 MiB pipeline buffers + headroom (< v7x 64 MiB)
_F32_MAX = 3.4028235e38


def _num_tensorcores():
    """Best-effort TensorCore count (2 on v7x, 1 on v5e/v6e).  Fallback: 1."""
    try:
        info = pltpu.get_tpu_info()
        for attr in ("num_cores", "core_count", "num_tensorcores", "tensorcore_count"):
            val = getattr(info, attr, None)
            if val is not None:
                val = int(val)
                if val > 0:
                    return min(val, 2)
    except Exception:
        pass
    return 1


def _chunk_stats(x, t, valid):
    """Per-chunk partial sums (p*t, p, t, bce), each reduced to (8, 128).

    Softplus-based sigmoid/BCE keeps the VPU op count low (no f32 divide):
      logd = log(1 + e^-x) = -log(sigmoid(x))
      p    = exp(-logd)    = sigmoid(x)
      -log(1 - p) = x + logd
    torch's binary_cross_entropy clamps both log terms at -100.
    """
    x = x.astype(jnp.float32)
    t = t.astype(jnp.float32)
    e = jnp.minimum(jnp.exp(-x), _F32_MAX)   # clamp avoids inf -> NaN downstream
    logd = jnp.log(1.0 + e)                  # = -log(p)
    p = jnp.exp(-logd)                       # = sigmoid(x)
    a = jnp.clip(x + logd, 0.0, 100.0)       # = -log(1-p), clamped (torch -100)
    b = jnp.minimum(logd, 100.0)             # = -log(p),   clamped (torch -100)
    bce = a + t * (b - a)                    # = -(t*log p + (1-t)*log(1-p)) >= 0
    pt = p * t
    if valid is not None:
        # Masked (ragged / overrun) chunk: force every contribution (including
        # any NaN/Inf garbage from Pallas-padded partial block reads) to zero.
        pt = jnp.where(valid, pt, 0.0)
        p = jnp.where(valid, p, 0.0)
        t = jnp.where(valid, t, 0.0)
        bce = jnp.where(valid, bce, 0.0)

    def tsum(v):  # (r, 128) -> (8, 128): retiling-free reshape + VPU adds only
        return v.reshape(-1, _SUB, _LANE).sum(axis=0)

    return tsum(pt), tsum(p), tsum(t), tsum(bce)


def _accumulate_block(x_ref, t_ref, acc_ref, *, n_full, chunk_rows, rem_rows,
                      block_start, n_valid, masked):
    """Accumulate one (block_rows, 128) block chunk-by-chunk into acc_ref."""

    def valid_mask(elem_start, rows_in_chunk):
        ri = jax.lax.broadcasted_iota(jnp.int32, (rows_in_chunk, _LANE), 0)
        li = jax.lax.broadcasted_iota(jnp.int32, (rows_in_chunk, _LANE), 1)
        return (elem_start + ri * _LANE + li) < n_valid

    def do_chunk(row_start, rows_in_chunk, carry):
        x = x_ref[pl.ds(row_start, rows_in_chunk), :]
        t = t_ref[pl.ds(row_start, rows_in_chunk), :]
        valid = (valid_mask(block_start + row_start * _LANE, rows_in_chunk)
                 if masked else None)
        stats = _chunk_stats(x, t, valid)
        return tuple(c + s for c, s in zip(carry, stats))

    zero = jnp.zeros((_SUB, _LANE), jnp.float32)
    carry = (zero, zero, zero, zero)

    if n_full > 0:
        def body(j, carry):
            start = pl.multiple_of(j * chunk_rows, _SUB)
            return do_chunk(start, chunk_rows, carry)
        carry = jax.lax.fori_loop(0, n_full, body, carry)

    if rem_rows > 0:  # static tail chunk (block_rows not a multiple of chunk_rows)
        carry = do_chunk(n_full * chunk_rows, rem_rows, carry)

    for k in range(4):
        acc_ref[k] += carry[k]


def _dice_bce_kernel(x_ref, t_ref, out_ref, acc_ref, *, n_valid, block_rows,
                     chunk_rows, blocks_per_core):
    """Streaming reduction over (block_rows, 128) tiles.

    Grid is (n_cores, blocks_per_core): the leading axis splits the block range
    per core, the trailing axis is the serial reduction.  Each core keeps four
    (8, 128) partial sums in VMEM and dumps them to its own slab on its last step.
    """
    c = pl.program_id(0)
    i = pl.program_id(1)
    block_elems = block_rows * _LANE

    # Unclamped global block index (int32: supports n < 2**31 elements).  The
    # index_map clamps the actual DMA so overrun blocks of the per-core split
    # never read out of bounds; they fall into the fully-masked path below.
    gblock = c * blocks_per_core + i
    block_start = gblock * block_elems

    @pl.when(i == 0)
    def _():
        acc_ref[...] = jnp.zeros_like(acc_ref)

    n_full = block_rows // chunk_rows
    rem_rows = block_rows - n_full * chunk_rows
    run = functools.partial(
        _accumulate_block, x_ref, t_ref, acc_ref,
        n_full=n_full, chunk_rows=chunk_rows, rem_rows=rem_rows,
        block_start=block_start, n_valid=n_valid)

    block_is_full = (block_start + block_elems) <= n_valid

    @pl.when(block_is_full)
    def _():
        run(masked=False)

    @pl.when(jnp.logical_not(block_is_full))
    def _():
        run(masked=True)

    @pl.when(i == pl.num_programs(1) - 1)
    def _():
        out_ref[...] = acc_ref[...]


def dice_bce_loss(inputs, targets, smooth=1.0, *,
                  max_block_rows=_MAX_BLOCK_ROWS, chunk_rows=_CHUNK_ROWS):
    """Pallas equivalent of DiceBCELoss.forward(inputs, targets, smooth)."""
    n = inputs.size
    flat_x = inputs.reshape(-1)          # keep caller dtype; upcast in-kernel
    flat_t = targets.reshape(-1)

    padded_n = ((n + _ALIGN - 1) // _ALIGN) * _ALIGN
    if padded_n != n:                    # static check: no pad / no copy when aligned
        # TODO(synk): for non-1024-aligned inputs this pad is an extra HBM
        # read+write of both operands; a zero-copy ragged path needs 1-D blocks
        # or a manual-DMA tail and is left out for robustness.
        flat_x = jnp.pad(flat_x, (0, padded_n - n))
        flat_t = jnp.pad(flat_t, (0, padded_n - n))

    rows = padded_n // _LANE             # always a multiple of 8

    # Sublane multiple required for a non-full block of this dtype
    # (8 for f32, 16 for bf16/f16, 32 for int8/fp8).
    itemsize = max(1, jnp.dtype(inputs.dtype).itemsize)
    sub_mult = _SUB * max(1, 4 // itemsize)
    max_block_rows = max(sub_mult, (max_block_rows // sub_mult) * sub_mult)
    chunk_rows = max(_SUB, (chunk_rows // _SUB) * _SUB)

    block_rows = rows if rows <= max_block_rows else max_block_rows
    chunk_rows = min(chunk_rows, block_rows)

    n_blocks = pl.cdiv(rows, block_rows)
    n_cores = max(1, min(_num_tensorcores(), n_blocks))
    blocks_per_core = pl.cdiv(n_blocks, n_cores)

    x2 = flat_x.reshape(rows, _LANE)
    t2 = flat_t.reshape(rows, _LANE)

    def in_map(c, i):
        # Clamp so overrun replica blocks never read out of bounds; the kernel
        # masks their contribution to exactly zero.
        return (jnp.minimum(c * blocks_per_core + i, n_blocks - 1), 0)

    kernel = functools.partial(
        _dice_bce_kernel, n_valid=n, block_rows=block_rows,
        chunk_rows=chunk_rows, blocks_per_core=blocks_per_core)

    partials = pl.pallas_call(
        kernel,
        out_shape=jax.ShapeDtypeStruct((n_cores, 4, _SUB, _LANE), jnp.float32),
        grid_spec=pltpu.PrefetchScalarGridSpec(
            num_scalar_prefetch=0,
            grid=(n_cores, blocks_per_core),
            in_specs=[pl.BlockSpec((block_rows, _LANE), in_map),
                      pl.BlockSpec((block_rows, _LANE), in_map)],
            out_specs=pl.BlockSpec((None, 4, _SUB, _LANE),
                                   lambda c, i: (c, 0, 0, 0)),
            scratch_shapes=[pltpu.VMEM((4, _SUB, _LANE), jnp.float32)],
        ),
        # TODO(synk): on v7x verify the leading axis actually shards across the
        # two TensorCores; if not, switch its semantics to pltpu.CORE_PARALLEL.
        compiler_params=pltpu.CompilerParams(
            dimension_semantics=("parallel", "arbitrary"),
            vmem_limit_bytes=_VMEM_LIMIT_BYTES),
    )(x2, t2)

    # Tiny epilogue: one cross-lane reduce of (n_cores, 4, 8, 128) + scalar math.
    sums = jnp.sum(partials, axis=(0, 2, 3))
    inter, sum_p, sum_t, bce_sum = sums[0], sums[1], sums[2], sums[3]
    bce_mean = bce_sum / n
    dice_loss = 1.0 - (2.0 * inter + smooth) / (sum_p + sum_t + smooth)
    return bce_mean + dice_loss


def _dice_bce_ref(inputs, targets, smooth=1.0):
    p = jax.nn.sigmoid(inputs.astype(jnp.float32)).reshape(-1)
    t = targets.astype(jnp.float32).reshape(-1)
    inter = jnp.sum(p * t)
    dice_loss = 1.0 - (2.0 * inter + smooth) / (jnp.sum(p) + jnp.sum(t) + smooth)
    bce = jnp.mean(-(t * jnp.log(p) + (1.0 - t) * jnp.log1p(-p)))
    return bce + dice_loss


if __name__ == "__main__":
    key = jax.random.PRNGKey(0)
    k1, k2, k3, k4, k5, k6 = jax.random.split(key, 6)

    # Case 1: small NCHW logits/targets, exactly tile-aligned (2*4*16*16 = 2048).
    x1 = jax.random.normal(k1, (2, 4, 16, 16), dtype=jnp.float32)            # logits
    y1 = (jax.random.uniform(k2, (2, 4, 16, 16)) > 0.5).astype(jnp.float32)  # binary
    loss1 = dice_bce_loss(x1, y1, smooth=1.0)
    jax.block_until_ready(loss1)
    ref1 = _dice_bce_ref(x1, y1, smooth=1.0)
    assert jnp.allclose(loss1, ref1, atol=1e-5, rtol=1e-5), (loss1, ref1)

    # Case 2: ragged size (2*5*25*10 = 2500) with a tiny block to exercise the
    # multi-block / masked-tail / overrun-block / per-core-split paths.
    x2 = jax.random.normal(k3, (2, 5, 25, 10), dtype=jnp.float32)
    y2 = (jax.random.uniform(k4, (2, 5, 25, 10)) > 0.5).astype(jnp.float32)
    loss2 = dice_bce_loss(x2, y2, smooth=1.0, max_block_rows=8)
    jax.block_until_ready(loss2)
    ref2 = _dice_bce_ref(x2, y2, smooth=1.0)
    assert jnp.allclose(loss2, ref2, atol=1e-5, rtol=1e-5), (loss2, ref2)

    # Case 3: bf16 logits/targets, aligned (2*8*64*64 = 65536): exercises the
    # narrow-dtype path and the multi-chunk in-kernel fori_loop.
    x3 = jax.random.normal(k5, (2, 8, 64, 64), dtype=jnp.bfloat16)
    y3 = (jax.random.uniform(k6, (2, 8, 64, 64)) > 0.5).astype(jnp.bfloat16)
    loss3 = dice_bce_loss(x3, y3, smooth=1.0)
    jax.block_until_ready(loss3)
    ref3 = _dice_bce_ref(x3, y3, smooth=1.0)
    assert jnp.allclose(loss3, ref3, atol=1e-4, rtol=1e-4), (loss3, ref3)

    print("KERNEL_OK")
</pallas_src>

<mosaic_0001>
module attributes {stable_mosaic.version = 11 : i64} {
  func.func @_dice_bce_kernel(%arg0: i32, %arg1: i32, %arg2: memref<16x128xf32, #tpu.memory_space<vmem>>, %arg3: memref<16x128xf32, #tpu.memory_space<vmem>>, %arg4: memref<1x4x8x128xf32, #tpu.memory_space<vmem>>, %arg5: memref<4x8x128xf32, #tpu.memory_space<vmem>>) attributes {dimension_semantics = [#tpu.dimension_semantics<parallel>, #tpu.dimension_semantics<arbitrary>], iteration_bounds = array<i64: 1, 1>, scalar_prefetch = 0 : i64, scratch_operands = 1 : i64, tpu.core_type = #tpu.core_type<tc>, window_params = [{transform_indices = @transform_0, window_bounds = array<i64: 16, 128>}, {transform_indices = @transform_1, window_bounds = array<i64: 16, 128>}, {transform_indices = @transform_2, window_bounds = array<i64: 1, 4, 8, 128>}]} {
    %c1_i32 = arith.constant 1 : i32
    %0 = arith.muli %arg0, %c1_i32 : i32
    %1 = arith.addi %0, %arg1 : i32
    %c2048_i32 = arith.constant 2048 : i32
    %2 = arith.muli %1, %c2048_i32 : i32
    %c0_i32 = arith.constant 0 : i32
    %3 = arith.cmpi eq, %arg1, %c0_i32 : i32
    %4 = arith.extui %3 : i1 to i32
    %c0_i32_0 = arith.constant 0 : i32
    %5 = arith.cmpi ne, %4, %c0_i32_0 : i32
    scf.if %5 {
      %cst = arith.constant 0.000000e+00 : f32
      %16 = vector.broadcast %cst : f32 to vector<4x8x128xf32>
      %c0 = arith.constant 0 : index
      %c0_7 = arith.constant 0 : index
      %c0_8 = arith.constant 0 : index
      %17 = vector.load %arg5[%c0, %c0_7, %c0_8] : memref<4x8x128xf32, #tpu.memory_space<vmem>>, vector<4x8x128xf32>
      tpu.vector_store %arg5[%c0, %c0_7, %c0_8], %16 {strides = array<i32>} : memref<4x8x128xf32, #tpu.memory_space<vmem>>, vector<4x8x128xf32>,
    } else {
    }
    %c2048_i32_1 = arith.constant 2048 : i32
    %6 = arith.addi %2, %c2048_i32_1 : i32
    %c2048_i32_2 = arith.constant 2048 : i32
    %7 = arith.cmpi sle, %6, %c2048_i32_2 : i32
    %8 = arith.extui %7 : i1 to i32
    %c0_i32_3 = arith.constant 0 : i32
    %9 = arith.cmpi ne, %8, %c0_i32_3 : i32
    scf.if %9 {
      %cst = arith.constant 0.000000e+00 : f32
      %16 = vector.broadcast %cst : f32 to vector<8x128xf32>
      %c0_i32_7 = arith.constant 0 : i32
      %c16_i32 = arith.constant 16 : i32
      %17 = arith.muli %c0_i32_7, %c16_i32 : i32
      %18 = tpu.assume_multiple %17, 8 : i32
      %19 = arith.index_cast %18 : i32 to index
      %c0 = arith.constant 0 : index
      %20 = vector.load %arg2[%19, %c0] : memref<16x128xf32, #tpu.memory_space<vmem>>, vector<16x128xf32>
      %21 = arith.index_cast %18 : i32 to index
      %c0_8 = arith.constant 0 : index
      %22 = vector.load %arg3[%21, %c0_8] : memref<16x128xf32, #tpu.memory_space<vmem>>, vector<16x128xf32>
      %cst_9 = arith.constant 0.000000e+00 : f32
      %23 = vector.broadcast %cst_9 : f32 to vector<16x128xf32>
      %24 = arith.subf %23, %20 : vector<16x128xf32>
      %25 = math.exp %24 : vector<16x128xf32>
      %cst_10 = arith.constant 3.40282347E+38 : f32
      %26 = vector.broadcast %cst_10 : f32 to vector<16x128xf32>
      %27 = arith.minimumf %25, %26 : vector<16x128xf32>
      %cst_11 = arith.constant 1.000000e+00 : f32
      %28 = vector.broadcast %cst_11 : f32 to vector<16x128xf32>
      %29 = arith.addf %28, %27 : vector<16x128xf32>
      %30 = math.log %29 : vector<16x128xf32>
      %cst_12 = arith.constant 0.000000e+00 : f32
      %31 = vector.broadcast %cst_12 : f32 to vector<16x128xf32>
      %32 = arith.subf %31, %30 : vector<16x128xf32>
      %33 = math.exp %32 : vector<16x128xf32>
      %34 = arith.addf %20, %30 : vector<16x128xf32>
      %cst_13 = arith.constant 0.000000e+00 : f32
      %cst_14 = arith.constant 1.000000e+02 : f32
      %35 = vector.broadcast %cst_13 : f32 to vector<16x128xf32>
      %36 = arith.maximumf %35, %34 : vector<16x128xf32>
      %37 = vector.broadcast %cst_14 : f32 to vector<16x128xf32>
      %38 = arith.minimumf %37, %36 : vector<16x128xf32>
      %cst_15 = arith.constant 1.000000e+02 : f32
      %39 = vector.broadcast %cst_15 : f32 to vector<16x128xf32>
      %40 = arith.minimumf %30, %39 : vector<16x128xf32>
      %41 = arith.subf %40, %38 : vector<16x128xf32>
      %42 = arith.mulf %22, %41 : vector<16x128xf32>
      %43 = arith.addf %38, %42 : vector<16x128xf32>
      %44 = arith.mulf %33, %22 : vector<16x128xf32>
      %45 = vector.shape_cast %44 : vector<16x128xf32> to vector<2x8x128xf32>
      %cst_16 = arith.constant dense<0.000000e+00> : vector<8x128xf32>
      %46 = vector.multi_reduction <add>, %45, %cst_16 [0] : vector<2x8x128xf32> to vector<8x128xf32>
      %47 = vector.shape_cast %33 : vector<16x128xf32> to vector<2x8x128xf32>
      %cst_17 = arith.constant dense<0.000000e+00> : vector<8x128xf32>
      %48 = vector.multi_reduction <add>, %47, %cst_17 [0] : vector<2x8x128xf32> to vector<8x128xf32>
      %49 = vector.shape_cast %22 : vector<16x128xf32> to vector<2x8x128xf32>
      %cst_18 = arith.constant dense<0.000000e+00> : vector<8x128xf32>
      %50 = vector.multi_reduction <add>, %49, %cst_18 [0] : vector<2x8x128xf32> to vector<8x128xf32>
      %51 = vector.shape_cast %43 : vector<16x128xf32> to vector<2x8x128xf32>
      %cst_19 = arith.constant dense<0.000000e+00> : vector<8x128xf32>
      %52 = vector.multi_reduction <add>, %51, %cst_19 [0] : vector<2x8x128xf32> to vector<8x128xf32>
      %53 = arith.addf %16, %46 : vector<8x128xf32>
      %54 = arith.addf %16, %48 : vector<8x128xf32>
      %55 = arith.addf %16, %50 : vector<8x128xf32>
      %56 = arith.addf %16, %52 : vector<8x128xf32>
      %c1_i32_20 = arith.constant 1 : i32
      %c0_21 = arith.constant 0 : index
      %c0_22 = arith.constant 0 : index
      %c0_23 = arith.constant 0 : index
      %57 = vector.load %arg5[%c0_21, %c0_22, %c0_23] : memref<4x8x128xf32, #tpu.memory_space<vmem>>, vector<1x8x128xf32>
      %58 = vector.shape_cast %57 : vector<1x8x128xf32> to vector<8x128xf32>
      %59 = arith.addf %58, %53 : vector<8x128xf32>
      %c0_24 = arith.constant 0 : index
      %c0_25 = arith.constant 0 : index
      %c0_26 = arith.constant 0 : index
      %60 = vector.load %arg5[%c0_24, %c0_25, %c0_26] : memref<4x8x128xf32, #tpu.memory_space<vmem>>, vector<1x8x128xf32>
      %61 = vector.shape_cast %60 : vector<1x8x128xf32> to vector<8x128xf32>
      %62 = vector.shape_cast %59 : vector<8x128xf32> to vector<1x8x128xf32>
      tpu.vector_store %arg5[%c0_24, %c0_25, %c0_26], %62 {strides = array<i32>} : memref<4x8x128xf32, #tpu.memory_space<vmem>>, vector<1x8x128xf32>,
      %c1 = arith.constant 1 : index
      %c0_27 = arith.constant 0 : index
      %c0_28 = arith.constant 0 : index
      %63 = vector.load %arg5[%c1, %c0_27, %c0_28] : memref<4x8x128xf32, #tpu.memory_space<vmem>>, vector<1x8x128xf32>
      %64 = vector.shape_cast %63 : vector<1x8x128xf32> to vector<8x128xf32>
      %65 = arith.addf %64, %54 : vector<8x128xf32>
      %c1_29 = arith.constant 1 : index
      %c0_30 = arith.constant 0 : index
      %c0_31 = arith.constant 0 : index
      %66 = vector.load %arg5[%c1_29, %c0_30, %c0_31] : memref<4x8x128xf32, #tpu.memory_space<vmem>>, vector<1x8x128xf32>
      %67 = vector.shape_cast %66 : vector<1x8x128xf32> to vector<8x128xf32>
      %68 = vector.shape_cast %65 : vector<8x128xf32> to vector<1x8x128xf32>
      tpu.vector_store %arg5[%c1_29, %c0_30, %c0_31], %68 {strides = array<i32>} : memref<4x8x128xf32, #tpu.memory_space<vmem>>, vector<1x8x128xf32>,
      %c2 = arith.constant 2 : index
      %c0_32 = arith.constant 0 : index
      %c0_33 = arith.constant 0 : index
      %69 = vector.load %arg5[%c2, %c0_32, %c0_33] : memref<4x8x128xf32, #tpu.memory_space<vmem>>, vector<1x8x128xf32>
      %70 = vector.shape_cast %69 : vector<1x8x128xf32> to vector<8x128xf32>
      %71 = arith.addf %70, %55 : vector<8x128xf32>
      %c2_34 = arith.constant 2 : index
      %c0_35 = arith.constant 0 : index
      %c0_36 = arith.constant 0 : index
      %72 = vector.load %arg5[%c2_34, %c0_35, %c0_36] : memref<4x8x128xf32, #tpu.memory_space<vmem>>, vector<1x8x128xf32>
      %73 = vector.shape_cast %72 : vector<1x8x128xf32> to vector<8x128xf32>
      %74 = vector.shape_cast %71 : vector<8x128xf32> to vector<1x8x128xf32>
      tpu.vector_store %arg5[%c2_34, %c0_35, %c0_36], %74 {strides = array<i32>} : memref<4x8x128xf32, #tpu.memory_space<vmem>>, vector<1x8x128xf32>,
      %c3 = arith.constant 3 : index
      %c0_37 = arith.constant 0 : index
      %c0_38 = arith.constant 0 : index
      %75 = vector.load %arg5[%c3, %c0_37, %c0_38] : memref<4x8x128xf32, #tpu.memory_space<vmem>>, vector<1x8x128xf32>
      %76 = vector.shape_cast %75 : vector<1x8x128xf32> to vector<8x128xf32>
      %77 = arith.addf %76, %56 : vector<8x128xf32>
      %c3_39 = arith.constant 3 : index
      %c0_40 = arith.constant 0 : index
      %c0_41 = arith.constant 0 : index
      %78 = vector.load %arg5[%c3_39, %c0_40, %c0_41] : memref<4x8x128xf32, #tpu.memory_space<vmem>>, vector<1x8x128xf32>
      %79 = vector.shape_cast %78 : vector<1x8x128xf32> to vector<8x128xf32>
      %80 = vector.shape_cast %77 : vector<8x128xf32> to vector<1x8x128xf32>
      tpu.vector_store %arg5[%c3_39, %c0_40, %c0_41], %80 {strides = array<i32>} : memref<4x8x128xf32, #tpu.memory_space<vmem>>, vector<1x8x128xf32>,
    } else {
    }
    %true = arith.constant true
    %10 = arith.xori %7, %true : i1
    %11 = arith.extui %10 : i1 to i32
    %c0_i32_4 = arith.constant 0 : i32
    %12 = arith.cmpi ne, %11, %c0_i32_4 : i32
    scf.if %12 {
      %cst = arith.constant 0.000000e+00 : f32
      %16 = vector.broadcast %cst : f32 to vector<8x128xf32>
      %c0_i32_7 = arith.constant 0 : i32
      %c16_i32 = arith.constant 16 : i32
      %17 = arith.muli %c0_i32_7, %c16_i32 : i32
      %18 = tpu.assume_multiple %17, 8 : i32
      %19 = arith.index_cast %18 : i32 to index
      %c0 = arith.constant 0 : index
      %20 = vector.load %arg2[%19, %c0] : memref<16x128xf32, #tpu.memory_space<vmem>>, vector<16x128xf32>
      %21 = arith.index_cast %18 : i32 to index
      %c0_8 = arith.constant 0 : index
      %22 = vector.load %arg3[%21, %c0_8] : memref<16x128xf32, #tpu.memory_space<vmem>>, vector<16x128xf32>
      %c128_i32 = arith.constant 128 : i32
      %23 = arith.muli %18, %c128_i32 : i32
      %24 = arith.addi %2, %23 : i32
      %25 = tpu.iota {dimensions = array<i32: 0>} : vector<16x128xi32>
      %26 = tpu.iota {dimensions = array<i32: 1>} : vector<16x128xi32>
      %c128_i32_9 = arith.constant 128 : i32
      %27 = vector.broadcast %c128_i32_9 : i32 to vector<16x128xi32>
      %28 = arith.muli %25, %27 : vector<16x128xi32>
      %29 = vector.broadcast %24 : i32 to vector<16x128xi32>
      %30 = arith.addi %29, %28 : vector<16x128xi32>
      %31 = arith.addi %30, %26 : vector<16x128xi32>
      %c2048_i32_10 = arith.constant 2048 : i32
      %32 = vector.broadcast %c2048_i32_10 : i32 to vector<16x128xi32>
      %33 = arith.cmpi slt, %31, %32 : vector<16x128xi32>
      %cst_11 = arith.constant 0.000000e+00 : f32
      %34 = vector.broadcast %cst_11 : f32 to vector<16x128xf32>
      %35 = arith.subf %34, %20 : vector<16x128xf32>
      %36 = math.exp %35 : vector<16x128xf32>
      %cst_12 = arith.constant 3.40282347E+38 : f32
      %37 = vector.broadcast %cst_12 : f32 to vector<16x128xf32>
      %38 = arith.minimumf %36, %37 : vector<16x128xf32>
      %cst_13 = arith.constant 1.000000e+00 : f32
      %39 = vector.broadcast %cst_13 : f32 to vector<16x128xf32>
      %40 = arith.addf %39, %38 : vector<16x128xf32>
      %41 = math.log %40 : vector<16x128xf32>
      %cst_14 = arith.constant 0.000000e+00 : f32
      %42 = vector.broadcast %cst_14 : f32 to vector<16x128xf32>
      %43 = arith.subf %42, %41 : vector<16x128xf32>
      %44 = math.exp %43 : vector<16x128xf32>
      %45 = arith.addf %20, %41 : vector<16x128xf32>
      %cst_15 = arith.constant 0.000000e+00 : f32
      %cst_16 = arith.constant 1.000000e+02 : f32
      %46 = vector.broadcast %cst_15 : f32 to vector<16x128xf32>
      %47 = arith.maximumf %46, %45 : vector<16x128xf32>
      %48 = vector.broadcast %cst_16 : f32 to vector<16x128xf32>
      %49 = arith.minimumf %48, %47 : vector<16x128xf32>
      %cst_17 = arith.constant 1.000000e+02 : f32
      %50 = vector.broadcast %cst_17 : f32 to vector<16x128xf32>
      %51 = arith.minimumf %41, %50 : vector<16x128xf32>
      %52 = arith.subf %51, %49 : vector<16x128xf32>
      %53 = arith.mulf %22, %52 : vector<16x128xf32>
      %54 = arith.addf %49, %53 : vector<16x128xf32>
      %55 = arith.mulf %44, %22 : vector<16x128xf32>
      %cst_18 = arith.constant 0.000000e+00 : f32
      %56 = vector.broadcast %cst_18 : f32 to vector<16x128xf32>
      %57 = arith.select %33, %55, %56 : vector<16x128xi1>, vector<16x128xf32>
      %cst_19 = arith.constant 0.000000e+00 : f32
      %58 = vector.broadcast %cst_19 : f32 to vector<16x128xf32>
      %59 = arith.select %33, %44, %58 : vector<16x128xi1>, vector<16x128xf32>
      %cst_20 = arith.constant 0.000000e+00 : f32
      %60 = vector.broadcast %cst_20 : f32 to vector<16x128xf32>
      %61 = arith.select %33, %22, %60 : vector<16x128xi1>, vector<16x128xf32>
      %cst_21 = arith.constant 0.000000e+00 : f32
      %62 = vector.broadcast %cst_21 : f32 to vector<16x128xf32>
      %63 = arith.select %33, %54, %62 : vector<16x128xi1>, vector<16x128xf32>
      %64 = vector.shape_cast %57 : vector<16x128xf32> to vector<2x8x128xf32>
      %cst_22 = arith.constant dense<0.000000e+00> : vector<8x128xf32>
      %65 = vector.multi_reduction <add>, %64, %cst_22 [0] : vector<2x8x128xf32> to vector<8x128xf32>
      %66 = vector.shape_cast %59 : vector<16x128xf32> to vector<2x8x128xf32>
      %cst_23 = arith.constant dense<0.000000e+00> : vector<8x128xf32>
      %67 = vector.multi_reduction <add>, %66, %cst_23 [0] : vector<2x8x128xf32> to vector<8x128xf32>
      %68 = vector.shape_cast %61 : vector<16x128xf32> to vector<2x8x128xf32>
      %cst_24 = arith.constant dense<0.000000e+00> : vector<8x128xf32>
      %69 = vector.multi_reduction <add>, %68, %cst_24 [0] : vector<2x8x128xf32> to vector<8x128xf32>
      %70 = vector.shape_cast %63 : vector<16x128xf32> to vector<2x8x128xf32>
      %cst_25 = arith.constant dense<0.000000e+00> : vector<8x128xf32>
      %71 = vector.multi_reduction <add>, %70, %cst_25 [0] : vector<2x8x128xf32> to vector<8x128xf32>
      %72 = arith.addf %16, %65 : vector<8x128xf32>
      %73 = arith.addf %16, %67 : vector<8x128xf32>
      %74 = arith.addf %16, %69 : vector<8x128xf32>
      %75 = arith.addf %16, %71 : vector<8x128xf32>
      %c1_i32_26 = arith.constant 1 : i32
      %c0_27 = arith.constant 0 : index
      %c0_28 = arith.constant 0 : index
      %c0_29 = arith.constant 0 : index
      %76 = vector.load %arg5[%c0_27, %c0_28, %c0_29] : memref<4x8x128xf32, #tpu.memory_space<vmem>>, vector<1x8x128xf32>
      %77 = vector.shape_cast %76 : vector<1x8x128xf32> to vector<8x128xf32>
      %78 = arith.addf %77, %72 : vector<8x128xf32>
      %c0_30 = arith.constant 0 : index
      %c0_31 = arith.constant 0 : index
      %c0_32 = arith.constant 0 : index
      %79 = vector.load %arg5[%c0_30, %c0_31, %c0_32] : memref<4x8x128xf32, #tpu.memory_space<vmem>>, vector<1x8x128xf32>
      %80 = vector.shape_cast %79 : vector<1x8x128xf32> to vector<8x128xf32>
      %81 = vector.shape_cast %78 : vector<8x128xf32> to vector<1x8x128xf32>
      tpu.vector_store %arg5[%c0_30, %c0_31, %c0_32], %81 {strides = array<i32>} : memref<4x8x128xf32, #tpu.memory_space<vmem>>, vector<1x8x128xf32>,
      %c1 = arith.constant 1 : index
      %c0_33 = arith.constant 0 : index
      %c0_34 = arith.constant 0 : index
      %82 = vector.load %arg5[%c1, %c0_33, %c0_34] : memref<4x8x128xf32, #tpu.memory_space<vmem>>, vector<1x8x128xf32>
      %83 = vector.shape_cast %82 : vector<1x8x128xf32> to vector<8x128xf32>
      %84 = arith.addf %83, %73 : vector<8x128xf32>
      %c1_35 = arith.constant 1 : index
      %c0_36 = arith.constant 0 : index
      %c0_37 = arith.constant 0 : index
      %85 = vector.load %arg5[%c1_35, %c0_36, %c0_37] : memref<4x8x128xf32, #tpu.memory_space<vmem>>, vector<1x8x128xf32>
      %86 = vector.shape_cast %85 : vector<1x8x128xf32> to vector<8x128xf32>
      %87 = vector.shape_cast %84 : vector<8x128xf32> to vector<1x8x128xf32>
      tpu.vector_store %arg5[%c1_35, %c0_36, %c0_37], %87 {strides = array<i32>} : memref<4x8x128xf32, #tpu.memory_space<vmem>>, vector<1x8x128xf32>,
      %c2 = arith.constant 2 : index
      %c0_38 = arith.constant 0 : index
      %c0_39 = arith.constant 0 : index
      %88 = vector.load %arg5[%c2, %c0_38, %c0_39] : memref<4x8x128xf32, #tpu.memory_space<vmem>>, vector<1x8x128xf32>
      %89 = vector.shape_cast %88 : vector<1x8x128xf32> to vector<8x128xf32>
      %90 = arith.addf %89, %74 : vector<8x128xf32>
      %c2_40 = arith.constant 2 : index
      %c0_41 = arith.constant 0 : index
      %c0_42 = arith.constant 0 : index
      %91 = vector.load %arg5[%c2_40, %c0_41, %c0_42] : memref<4x8x128xf32, #tpu.memory_space<vmem>>, vector<1x8x128xf32>
      %92 = vector.shape_cast %91 : vector<1x8x128xf32> to vector<8x128xf32>
      %93 = vector.shape_cast %90 : vector<8x128xf32> to vector<1x8x128xf32>
      tpu.vector_store %arg5[%c2_40, %c0_41, %c0_42], %93 {strides = array<i32>} : memref<4x8x128xf32, #tpu.memory_space<vmem>>, vector<1x8x128xf32>,
      %c3 = arith.constant 3 : index
      %c0_43 = arith.constant 0 : index
      %c0_44 = arith.constant 0 : index
      %94 = vector.load %arg5[%c3, %c0_43, %c0_44] : memref<4x8x128xf32, #tpu.memory_space<vmem>>, vector<1x8x128xf32>
      %95 = vector.shape_cast %94 : vector<1x8x128xf32> to vector<8x128xf32>
      %96 = arith.addf %95, %75 : vector<8x128xf32>
      %c3_45 = arith.constant 3 : index
      %c0_46 = arith.constant 0 : index
      %c0_47 = arith.constant 0 : index
      %97 = vector.load %arg5[%c3_45, %c0_46, %c0_47] : memref<4x8x128xf32, #tpu.memory_space<vmem>>, vector<1x8x128xf32>
      %98 = vector.shape_cast %97 : vector<1x8x128xf32> to vector<8x128xf32>
      %99 = vector.shape_cast %96 : vector<8x128xf32> to vector<1x8x128xf32>
      tpu.vector_store %arg5[%c3_45, %c0_46, %c0_47], %99 {strides = array<i32>} : memref<4x8x128xf32, #tpu.memory_space<vmem>>, vector<1x8x128xf32>,
    } else {
    }
    %c0_i32_5 = arith.constant 0 : i32
    %13 = arith.cmpi eq, %arg1, %c0_i32_5 : i32
    %14 = arith.extui %13 : i1 to i32
    %c0_i32_6 = arith.constant 0 : i32
    %15 = arith.cmpi ne, %14, %c0_i32_6 : i32
    scf.if %15 {
      %c0 = arith.constant 0 : index
      %c0_7 = arith.constant 0 : index
      %c0_8 = arith.constant 0 : index
      %16 = vector.load %arg5[%c0, %c0_7, %c0_8] : memref<4x8x128xf32, #tpu.memory_space<vmem>>, vector<4x8x128xf32>
      %c0_9 = arith.constant 0 : index
      %c0_10 = arith.constant 0 : index
      %c0_11 = arith.constant 0 : index
      %c0_12 = arith.constant 0 : index
      %17 = vector.load %arg4[%c0_9, %c0_10, %c0_11, %c0_12] : memref<1x4x8x128xf32, #tpu.memory_space<vmem>>, vector<1x4x8x128xf32>
      %18 = vector.shape_cast %17 : vector<1x4x8x128xf32> to vector<4x8x128xf32>
      %19 = vector.shape_cast %16 : vector<4x8x128xf32> to vector<1x4x8x128xf32>
      tpu.vector_store %arg4[%c0_9, %c0_10, %c0_11, %c0_12], %19 {strides = array<i32>} : memref<1x4x8x128xf32, #tpu.memory_space<vmem>>, vector<1x4x8x128xf32>,
    } else {
    }
    return
  }
  func.func @transform_0(%arg0: i32, %arg1: i32) -> (i32, i32) {
    %c1_i32 = arith.constant 1 : i32
    %0 = arith.muli %arg0, %c1_i32 : i32
    %1 = arith.addi %0, %arg1 : i32
    %c0_i32 = arith.constant 0 : i32
    %2 = arith.minsi %1, %c0_i32 : i32
    %c0_i32_0 = arith.constant 0 : i32
    %c0_i32_1 = arith.constant 0 : i32
    return %2, %c0_i32_0 : i32, i32
  }
  func.func @transform_1(%arg0: i32, %arg1: i32) -> (i32, i32) {
    %c1_i32 = arith.constant 1 : i32
    %0 = arith.muli %arg0, %c1_i32 : i32
    %1 = arith.addi %0, %arg1 : i32
    %c0_i32 = arith.constant 0 : i32
    %2 = arith.minsi %1, %c0_i32 : i32
    %c0_i32_0 = arith.constant 0 : i32
    %c0_i32_1 = arith.constant 0 : i32
    return %2, %c0_i32_0 : i32, i32
  }
  func.func @transform_2(%arg0: i32, %arg1: i32) -> (i32, i32, i32, i32) {
    %c0_i32 = arith.constant 0 : i32
    %c0_i32_0 = arith.constant 0 : i32
    %c0_i32_1 = arith.constant 0 : i32
    %c0_i32_2 = arith.constant 0 : i32
    return %arg0, %c0_i32, %c0_i32_0, %c0_i32_1 : i32, i32, i32, i32
  }
}

</mosaic_0001>

<bundles_post_ra>
// kernel: tpu_custom_call.1
= control target key start
LH: loop header
LB: loop body
LE: loop exit
PB: predicated region body
PF: predicated region fallthrough
CT: control target
= control target key end

     0   :  { %7 = vsyncpa [#allocation4], 0  ;;  %s416_s0 = inlined_call_operand.hbm [shape: f32[16,128], index: 0, kind: input, shape index: {}]   ;;  %s417_s1 = inlined_call_operand.hbm [shape: f32[16,128], index: 1, kind: input, shape index: {}]   ;;  %s418_s2 = inlined_call_operand.hbm [shape: f32[1,4,8,128], index: 2, kind: output, shape index: {}]  }
   0x1   :  { %8 = vsyncpa [#allocation7], 0 }
   0x2   :  { %9 = vsyncpa [#allocation5], 0  ;;  %s351_s9 = smov [#allocation3]   ;;  %s279_s13 = scalar_lea.hbm %s416_s0, 256 }
   0x3   :  { %s21_s10 = sshll.u32 %s351_s9, 4  ;;  %p280_p0 = scmp.ne.s32.totalorder %s416_s0, %s279_s13  ;;  %s22_s10 = int_to_ptr.vmem [resolvable:$true] %s21_s10 }
   0x4   :  { %p283_p1 = scmp.lt.u32.totalorder %s279_s13, %s416_s0 }
   0x6   :  { %p285_p2 = pnand %p283_p1, %p280_p0 }
   0x8   :  { %288 = shalt.err (!%p285_p2)
}
   0x9   :  { %s289_s18 = scalar_lea.vmem %s22_s10, 256  ;;  %p294_p4 = scmp.lt.s32.totalorder %s22_s10, %s22_s10 }
   0xa   :  { %p290_p3 = scmp.ne.s32.totalorder %s22_s10, %s289_s18  ;;  %p295_p5 = scmp.lt.s32.totalorder %s289_s18, %s289_s18 }
   0xc   :  { %p296_p6 = por %p295_p5, %p294_p4 }
   0xe   :  { %p297_p7 = pnand %p296_p6, %p290_p3 }
  0x10   :  { %300 = shalt.err (!%p297_p7)
}
  0x11   :  { %s352_s19 = smov 128   ;;  %s353_s20 = smov 8  }
  0x12   :  { %27 = dma.hbm_to_vmem [thread:$0]  %s416_s0, 256, %s22_s10, [#allocation4], %s352_s19, %s352_s19, %s353_s20  }
  0x13   :  { %s354_s23 = smov [#allocation6]   ;;  %s301_s27 = scalar_lea.hbm %s417_s1, 256 }
  0x14   :  { %s39_s24 = sshll.u32 %s354_s23, 4  ;;  %p302_p8 = scmp.ne.s32.totalorder %s417_s1, %s301_s27  ;;  %s40_s24 = int_to_ptr.vmem [resolvable:$true] %s39_s24 }
  0x15   :  { %p305_p9 = scmp.lt.u32.totalorder %s301_s27, %s417_s1 }
  0x17   :  { %p307_p10 = pnand %p305_p9, %p302_p8 }
  0x19   :  { %310 = shalt.err (!%p307_p10)
}
  0x1a   :  { %s311_s4 = scalar_lea.vmem %s40_s24, 256  ;;  %p316_p12 = scmp.lt.s32.totalorder %s40_s24, %s40_s24 }
  0x1b   :  { %p312_p11 = scmp.ne.s32.totalorder %s40_s24, %s311_s4  ;;  %p317_p13 = scmp.lt.s32.totalorder %s311_s4, %s311_s4 }
  0x1d   :  { %p318_p0 = por %p317_p13, %p316_p12 }
  0x1f   :  { %p319_p1 = pnand %p318_p0, %p312_p11 }
  0x21   :  { %322 = shalt.err (!%p319_p1)
}
  0x22   :  { %45 = dma.hbm_to_vmem [thread:$0]  %s417_s1, 256, %s40_s24, [#allocation7], %s352_s19, %s352_s19, %s353_s20  }
  0x23   :  { %345 = dma.done.wait [#allocation4], 256  }
  0x24   :  { %346 = vsyncadd [#allocation4], 4294967040 }
  0x25   :  { %347 = dma.done.wait [#allocation7], 256  }
  0x26   :  { %348 = vsyncadd [#allocation7], 4294967040  ;;  %v75_v0 = vld [vmem:[#allocation3] sm:$0xff]  ;;  %v76_v1 = vld [vmem:[#allocation3 + $0x8] sm:$0xff]  ;;  %s355_s1 = smov [#allocation8]  }
  0x27   :  { %v77_v2 = vld [vmem:[#allocation6] sm:$0xff]  ;;  %v78_v3 = vld [vmem:[#allocation6 + $0x8] sm:$0xff]  ;;  %v79_v4 = vsub.f32 0.0, %v75_v0  ;;  %v80_v5 = vsub.f32 0.0, %v76_v1  ;;  %s245_s6 = sshll.u32 %s355_s1, 4  ;;  %s246_s6 = int_to_ptr.vmem [resolvable:$true] %s245_s6 }
  0x28   :  { %v117_v6 = vadd.f32 %v78_v3, %v77_v2  ;;  %s323_s7 = scalar_lea.vmem %s246_s6, 512  ;;  %p328_p3 = scmp.lt.s32.totalorder %s246_s6, %s246_s6 }
  0x29   :  { %v81_v7 = vmul.f32 1.442695, %v79_v4  ;;  %v83_v8 = vmul.f32 1.442695, %v80_v5  ;;  %p324_p2 = scmp.ne.s32.totalorder %s246_s6, %s323_s7  ;;  %p329_p4 = scmp.lt.s32.totalorder %s323_s7, %s323_s7 }
  0x2a   :  { %238 = vst [vmem:[#allocation8 + $0x10] sm:$0xff] %v117_v6 }
  0x2b   :  { %267 = vpow2.f32 %v81_v7  ;;  %p330_p5 = por %p329_p4, %p328_p3 }
  0x2c   :  { %269 = vpow2.f32 %v83_v8 }
  0x2d   :  { %p331_p6 = pnand %p330_p5, %p324_p2 }
  0x35   :  { %v268_v9 = vpop.eup %267 }
  0x36   :  { %v270_v10 = vpop.eup %269  ;;  %v85_v11 = vmin.f32 %v268_v9, 3.4028235e+38 }
  0x37   :  { %v86_v12 = vmin.f32 %v270_v10, 3.4028235e+38 }
  0x38   :  { %v87_v13 = vadd.f32 1.0, %v85_v11 }
  0x39   :  { %v88_v14 = vadd.f32 1.0, %v86_v12 }
  0x3a   :  { %271 = vlog2.f32 %v87_v13 }
  0x3b   :  { %273 = vlog2.f32 %v88_v14 }
  0x44   :  { %v272_v15 = vpop.eup %271 }
  0x45   :  { %v274_v16 = vpop.eup %273  ;;  %v90_v17 = vmul.f32 0.6931472, %v272_v15 }
  0x46   :  { %v92_v18 = vmul.f32 0.6931472, %v274_v16 }
  0x47   :  { %v93_v19 = vsub.f32 0.0, %v90_v17  ;;  %v99_v20 = vadd.f32 %v90_v17, %v75_v0  ;;  %v105_v25 = vmin.f32 %v90_v17, 100.0 }
  0x48   :  { %v94_v21 = vsub.f32 0.0, %v92_v18  ;;  %v100_v22 = vadd.f32 %v92_v18, %v76_v1  ;;  %v106_v28 = vmin.f32 %v92_v18, 100.0 }
  0x49   :  { %v95_v23 = vmul.f32 1.442695, %v93_v19  ;;  %v101_v24 = vmax.f32 %v99_v20, 0.0 }
  0x4a   :  { %v97_v26 = vmul.f32 1.442695, %v94_v21  ;;  %v102_v27 = vmax.f32 %v100_v22, 0.0 }
  0x4b   :  { %275 = vpow2.f32 %v95_v23  ;;  %v103_v29 = vmin.f32 %v101_v24, 100.0 }
  0x4c   :  { %277 = vpow2.f32 %v97_v26  ;;  %v104_v30 = vmin.f32 %v102_v27, 100.0 }
  0x4d   :  { %v107_v31 = vsub.f32 %v105_v25, %v103_v29 }
  0x4e   :  { %v108_v32 = vsub.f32 %v106_v28, %v104_v30 }
  0x4f   :  { %v109_v33 = vmul.f32 %v107_v31, %v77_v2 }
  0x50   :  { %v110_v34 = vmul.f32 %v108_v32, %v78_v3 }
  0x51   :  { %v111_v35 = vadd.f32 %v109_v33, %v103_v29 }
  0x52   :  { %v112_v36 = vadd.f32 %v110_v34, %v104_v30 }
  0x54   :  { %v118_v37 = vadd.f32 %v112_v36, %v111_v35 }
  0x55   :  { %v276_v38 = vpop.eup %275 }
  0x56   :  { %v278_v39 = vpop.eup %277  ;;  %v113_v40 = vmul.f32 %v276_v38, %v77_v2  ;;  %239 = vst [vmem:[#allocation8 + $0x18] sm:$0xff] %v118_v37 }
  0x57   :  { %v114_v41 = vmul.f32 %v278_v39, %v78_v3  ;;  %v116_v42 = vadd.f32 %v278_v39, %v276_v38 }
  0x59   :  { %v115_v43 = vadd.f32 %v114_v41, %v113_v40  ;;  %237 = vst [vmem:[#allocation8 + $0x8] sm:$0xff] %v116_v42 }
  0x5b   :  { %236 = vst [vmem:[#allocation8] sm:$0xff] %v115_v43 }
  0x5c   :  { %334 = shalt.err (!%p331_p6)
}
  0x5d   :  { %s335_s10 = scalar_lea.hbm %s418_s2, 512 }
  0x5e   :  { %p336_p7 = scmp.ne.s32.totalorder %s418_s2, %s335_s10  ;;  %p339_p8 = scmp.lt.u32.totalorder %s335_s10, %s418_s2 }
  0x60   :  { %p341_p9 = pnand %p339_p8, %p336_p7 }
  0x62   :  { %344 = shalt.err (!%p341_p9)
}
  0x63   :  { %251 = dma.vmem_to_hbm [thread:$0]  %s246_s6, 512, %s418_s2, [#allocation5], %s352_s19, %s352_s19, %s353_s20  }
  0x64   :  { %349 = dma.done.wait [#allocation5], 512  }
  0x65   :  { %350 = vsyncadd [#allocation5], 4294966784 }
  0x66   :  { %255 = vsyncpa [#allocation4], 1 }
  0x67   :  { %256 = vsyncpa [#allocation7], 1 }
  0x68   :  { %257 = vsyncpa [#allocation5], 1 }

</bundles_post_ra>
